<compile_context>
chip_gen: v6e
topology: v6e:2x2x1
jax: 0.10.0
libtpu: 0.0.40
codegen_flags: <defaults>
</compile_context>

<pallas_src>
import jax
import jax.numpy as jnp
from jax.experimental import pallas as pl
from jax.experimental.pallas import tpu as pltpu

K_IN = 28 * 28          # 784 input features (full last dim -> lane rule OK)
N_OUT = 10              # logits
NP_OUT = 128            # lane-dense padded logits width


def toy_fc_kernel(x_ref, w0_ref, b0_ref, w1_ref, b1_ref, out_ref):
    # x_ref : [TB, 784]  f32   (cast to bf16 here; avoids a separate HBM pass)
    # w0_ref: [784, Hp]  bf16  (VMEM-resident)
    # b0_ref: [1, Hp]    f32
    # w1_ref: [Hp, 128]  bf16  (unit mask pre-folded, 10 -> 128 padded)
    # b1_ref: [1, 128]   f32
    # out   : [TB, 128]  f32
    x = x_ref[...].astype(jnp.bfloat16)
    h = jnp.dot(x, w0_ref[...], preferred_element_type=jnp.float32)
    h = jnp.maximum(h + b0_ref[...], 0.0)                          # fc_0 + ReLU
    out = jnp.dot(h.astype(jnp.bfloat16), w1_ref[...],
                  preferred_element_type=jnp.float32)              # fc_1
    out_ref[...] = out + b1_ref[...]


def prepare_toy_fc_params(w0, b0, w1, b1, mask=None):
    """One-time weight prep, hoisted out of the per-call path.

    mask=None reproduces the default forward (use_rank=False); a 0/1 vector of
    length n_units reproduces the use_rank=True & use_mask=True path via
    (h * m) @ W1 == h @ (diag(m) @ W1), i.e. the mask is folded into W1.
    """
    H = w0.shape[1]
    if mask is not None:
        w1 = w1 * mask.reshape(H, 1).astype(w1.dtype)

    Hp = pl.cdiv(H, 128) * 128              # keep hidden dim lane-aligned
    if Hp != H:
        w0 = jnp.zeros((K_IN, Hp), w0.dtype).at[:, :H].set(w0)
        b0 = jnp.zeros((Hp,), b0.dtype).at[:H].set(b0)
        w1 = jnp.zeros((Hp, N_OUT), w1.dtype).at[:H, :].set(w1)

    w0_p = w0.astype(jnp.bfloat16)                                    # [784, Hp]
    b0_p = b0.reshape(1, Hp).astype(jnp.float32)                      # [1, Hp]
    w1_p = (jnp.zeros((Hp, NP_OUT), jnp.float32)
            .at[:, :N_OUT].set(w1.astype(jnp.float32))
            .astype(jnp.bfloat16))                                    # [Hp, 128]
    b1_p = (jnp.zeros((1, NP_OUT), jnp.float32)
            .at[:, :N_OUT].set(b1.reshape(1, N_OUT).astype(jnp.float32)))
    return w0_p, b0_p, w1_p, b1_p


def _pick_batch_tile(B):
    # <= 512-row tiles keep the double-buffered f32 x tile + h intermediate +
    # resident weights well under v5e's 16 MiB scoped-VMEM default.
    TB = min(512, max(8, pl.cdiv(B, 8) * 8))
    # v7x has 2 TensorCores: make sure large batches give >= 2 "parallel" steps.
    if B >= 256 and pl.cdiv(B, TB) < 2:
        TB = max(8, pl.cdiv(pl.cdiv(B, 2), 8) * 8)
    return TB


def toy_fc_forward_prepared(x_nchw, params):
    """x_nchw: [B, 1, 28, 28] float. Returns logits [B, 10] float32."""
    w0_p, b0_p, w1_p, b1_p = params
    Hp = w0_p.shape[1]
    B = x_nchw.shape[0]

    x2d = x_nchw.reshape(B, K_IN).astype(jnp.float32)       # x.view(-1, 784)

    TB = _pick_batch_tile(B)
    Bp = pl.cdiv(B, TB) * TB
    if Bp != B:                                  # pad only when actually needed
        x2d = jnp.concatenate(
            [x2d, jnp.zeros((Bp - B, K_IN), jnp.float32)], axis=0)

    grid = (Bp // TB,)

    # Constant-index weight/bias blocks are DMA'd once; single-buffer them when
    # this JAX exposes pl.Buffered (VMEM headroom, mainly for v7x's 64 MiB).
    resident = (dict(pipeline_mode=pl.Buffered(1))
                if hasattr(pl, "Buffered") else {})

    cost = pl.CostEstimate(
        flops=2 * Bp * K_IN * Hp + 2 * Bp * Hp * NP_OUT,
        transcendentals=0,
        bytes_accessed=(Bp * K_IN * 4 + w0_p.size * 2 + w1_p.size * 2
                        + b0_p.size * 4 + b1_p.size * 4 + Bp * NP_OUT * 4),
    )

    out_padded = pl.pallas_call(
        toy_fc_kernel,
        out_shape=jax.ShapeDtypeStruct((Bp, NP_OUT), jnp.float32),
        grid_spec=pltpu.PrefetchScalarGridSpec(
            num_scalar_prefetch=0,
            grid=grid,
            in_specs=[
                pl.BlockSpec((TB, K_IN), lambda i: (i, 0)),               # x tile
                pl.BlockSpec((K_IN, Hp), lambda i: (0, 0), **resident),   # W0
                pl.BlockSpec((1, Hp), lambda i: (0, 0), **resident),      # b0
                pl.BlockSpec((Hp, NP_OUT), lambda i: (0, 0), **resident), # W1
                pl.BlockSpec((1, NP_OUT), lambda i: (0, 0), **resident),  # b1
            ],
            out_specs=pl.BlockSpec((TB, NP_OUT), lambda i: (i, 0)),
        ),
        compiler_params=pltpu.CompilerParams(
            dimension_semantics=("parallel",)),
        cost_estimate=cost,
    )(x2d, w0_p, b0_p, w1_p, b1_p)

    return out_padded[:B, :N_OUT]


def toy_fc_forward(x_nchw, w0, b0, w1, b1, mask=None):
    """Convenience wrapper: folds the (cheap) weight prep into the call.
    For repeated calls with static weights, call prepare_toy_fc_params once
    and reuse toy_fc_forward_prepared (optionally under jax.jit)."""
    return toy_fc_forward_prepared(
        x_nchw, prepare_toy_fc_params(w0, b0, w1, b1, mask))


def init_params(key, n_units):
    """Deterministic PyTorch-nn.Linear-style init (uniform +-1/sqrt(fan_in))."""
    k0w, k0b, k1w, k1b = jax.random.split(key, 4)
    bound0 = 1.0 / jnp.sqrt(K_IN)
    w0 = jax.random.uniform(k0w, (K_IN, n_units), jnp.float32, -bound0, bound0)
    b0 = jax.random.uniform(k0b, (n_units,), jnp.float32, -bound0, bound0)
    bound1 = 1.0 / jnp.sqrt(n_units)
    w1 = jax.random.uniform(k1w, (n_units, N_OUT), jnp.float32, -bound1, bound1)
    b1 = jax.random.uniform(k1b, (N_OUT,), jnp.float32, -bound1, bound1)
    return w0, b0, w1, b1


def _ref_same_precision(x2d, w0, b0, w1, b1, mask=None):
    """Plain-JAX reference matching the kernel's bf16/f32 precision path."""
    h = jnp.dot(x2d.astype(jnp.bfloat16), w0.astype(jnp.bfloat16),
                preferred_element_type=jnp.float32) + b0
    h = jnp.maximum(h, 0.0)
    if mask is not None:
        w1 = w1 * mask[:, None]
    return jnp.dot(h.astype(jnp.bfloat16), w1.astype(jnp.bfloat16),
                   preferred_element_type=jnp.float32) + b1


if __name__ == "__main__":
    key = jax.random.PRNGKey(0)
    kx, kp, km, kx2 = jax.random.split(key, 4)

    B = 2
    n_units = 256          # small stand-in for the default n_units=1024
    percentage = 0.1

    # MNIST-like NCHW input [B, 1, 28, 28]
    x = jax.random.normal(kx, (B, 1, 28, 28), jnp.float32)
    w0, b0, w1, b1 = init_params(kp, n_units)
    x2d = x.reshape(B, K_IN)

    fwd = jax.jit(toy_fc_forward_prepared)

    # ---- default forward path (use_rank=False): no mask --------------------
    params = prepare_toy_fc_params(w0, b0, w1, b1, mask=None)
    out = jax.block_until_ready(fwd(x, params))
    assert out.shape == (B, N_OUT), out.shape

    ref_bf16 = _ref_same_precision(x2d, w0, b0, w1, b1)
    ref_f32 = jnp.maximum(x2d @ w0 + b0, 0.0) @ w1 + b1
    assert jnp.allclose(out, ref_bf16, atol=2e-3, rtol=2e-3)
    assert jnp.allclose(out, ref_f32, atol=5e-2, rtol=5e-2)

    # ---- masked path (use_rank=True, use_mask=True): bernoulli(p) mask -----
    rnd_mask = (jax.random.uniform(km, (n_units,)) < percentage).astype(jnp.float32)
    params_m = prepare_toy_fc_params(w0, b0, w1, b1, mask=rnd_mask)
    out_m = jax.block_until_ready(fwd(x, params_m))
    ref_m_bf16 = _ref_same_precision(x2d, w0, b0, w1, b1, rnd_mask)
    ref_m_f32 = (jnp.maximum(x2d @ w0 + b0, 0.0) * rnd_mask) @ w1 + b1
    assert jnp.allclose(out_m, ref_m_bf16, atol=2e-3, rtol=2e-3)
    assert jnp.allclose(out_m, ref_m_f32, atol=5e-2, rtol=5e-2)

    # ---- larger batch: exercises batch padding + the >=2-step parallel grid
    B2 = 300
    x_big = jax.random.normal(kx2, (B2, 1, 28, 28), jnp.float32)
    out_big = jax.block_until_ready(fwd(x_big, params))
    assert out_big.shape == (B2, N_OUT)
    ref_big = _ref_same_precision(x_big.reshape(B2, K_IN), w0, b0, w1, b1)
    assert jnp.allclose(out_big, ref_big, atol=2e-3, rtol=2e-3)

    print("KERNEL_OK")
</pallas_src>

<mosaic_0001>
module attributes {stable_mosaic.version = 11 : i64} {
  func.func @toy_fc_kernel(%arg0: i32, %arg1: memref<8x784xf32, #tpu.memory_space<vmem>>, %arg2: memref<784x256xbf16, #tpu.memory_space<vmem>>, %arg3: memref<1x256xf32, #tpu.memory_space<vmem>>, %arg4: memref<256x128xbf16, #tpu.memory_space<vmem>>, %arg5: memref<1x128xf32, #tpu.memory_space<vmem>>, %arg6: memref<8x128xf32, #tpu.memory_space<vmem>>) attributes {dimension_semantics = [#tpu.dimension_semantics<parallel>], iteration_bounds = array<i64: 1>, scalar_prefetch = 0 : i64, scratch_operands = 0 : i64, tpu.core_type = #tpu.core_type<tc>, window_params = [{transform_indices = @transform_0, window_bounds = array<i64: 8, 784>}, {pipeline_mode = #tpu.pipeline_mode<synchronous>, transform_indices = @transform_1, window_bounds = array<i64: 784, 256>}, {pipeline_mode = #tpu.pipeline_mode<synchronous>, transform_indices = @transform_2, window_bounds = array<i64: 1, 256>}, {pipeline_mode = #tpu.pipeline_mode<synchronous>, transform_indices = @transform_3, window_bounds = array<i64: 256, 128>}, {pipeline_mode = #tpu.pipeline_mode<synchronous>, transform_indices = @transform_4, window_bounds = array<i64: 1, 128>}, {transform_indices = @transform_5, window_bounds = array<i64: 8, 128>}]} {
    %c0 = arith.constant 0 : index
    %c0_0 = arith.constant 0 : index
    %0 = vector.load %arg1[%c0, %c0_0] : memref<8x784xf32, #tpu.memory_space<vmem>>, vector<8x784xf32>
    %1 = arith.truncf %0 : vector<8x784xf32> to vector<8x784xbf16>
    %c0_1 = arith.constant 0 : index
    %c0_2 = arith.constant 0 : index
    %2 = vector.load %arg2[%c0_1, %c0_2] : memref<784x256xbf16, #tpu.memory_space<vmem>>, vector<784x256xbf16>
    %cst = arith.constant dense<0.000000e+00> : vector<8x256xf32>
    %3 = tpu.matmul %1, %2, %cst {dimension_numbers = #tpu.dot_dimension_numbers<[1], [0], [0], [1], [0, 0, 1, 1], [], []>} : vector<8x784xbf16>, vector<784x256xbf16>, vector<8x256xf32> -> vector<8x256xf32>
    %c0_3 = arith.constant 0 : index
    %c0_4 = arith.constant 0 : index
    %4 = vector.load %arg3[%c0_3, %c0_4] : memref<1x256xf32, #tpu.memory_space<vmem>>, vector<1x256xf32>
    %5 = vector.broadcast %4 : vector<1x256xf32> to vector<8x256xf32>
    %6 = arith.addf %3, %5 : vector<8x256xf32>
    %cst_5 = arith.constant 0.000000e+00 : f32
    %7 = vector.broadcast %cst_5 : f32 to vector<8x256xf32>
    %8 = arith.maximumf %6, %7 : vector<8x256xf32>
    %9 = arith.truncf %8 : vector<8x256xf32> to vector<8x256xbf16>
    %c0_6 = arith.constant 0 : index
    %c0_7 = arith.constant 0 : index
    %10 = vector.load %arg4[%c0_6, %c0_7] : memref<256x128xbf16, #tpu.memory_space<vmem>>, vector<256x128xbf16>
    %cst_8 = arith.constant dense<0.000000e+00> : vector<8x128xf32>
    %11 = tpu.matmul %9, %10, %cst_8 {dimension_numbers = #tpu.dot_dimension_numbers<[1], [0], [0], [1], [0, 0, 1, 1], [], []>} : vector<8x256xbf16>, vector<256x128xbf16>, vector<8x128xf32> -> vector<8x128xf32>
    %c0_9 = arith.constant 0 : index
    %c0_10 = arith.constant 0 : index
    %12 = vector.load %arg5[%c0_9, %c0_10] : memref<1x128xf32, #tpu.memory_space<vmem>>, vector<1x128xf32>
    %13 = vector.broadcast %12 : vector<1x128xf32> to vector<8x128xf32>
    %14 = arith.addf %11, %13 : vector<8x128xf32>
    %c0_11 = arith.constant 0 : index
    %c0_12 = arith.constant 0 : index
    %15 = vector.load %arg6[%c0_11, %c0_12] : memref<8x128xf32, #tpu.memory_space<vmem>>, vector<8x128xf32>
    tpu.vector_store %arg6[%c0_11, %c0_12], %14 {strides = array<i32>} : memref<8x128xf32, #tpu.memory_space<vmem>>, vector<8x128xf32>,
    return
  }
  func.func @transform_0(%arg0: i32) -> (i32, i32) {
    %c0_i32 = arith.constant 0 : i32
    %c0_i32_0 = arith.constant 0 : i32
    return %arg0, %c0_i32 : i32, i32
  }
  func.func @transform_1(%arg0: i32) -> (i32, i32) {
    %c0_i32 = arith.constant 0 : i32
    %c0_i32_0 = arith.constant 0 : i32
    %c0_i32_1 = arith.constant 0 : i32
    return %c0_i32, %c0_i32_0 : i32, i32
  }
  func.func @transform_2(%arg0: i32) -> (i32, i32) {
    %c0_i32 = arith.constant 0 : i32
    %c0_i32_0 = arith.constant 0 : i32
    %c0_i32_1 = arith.constant 0 : i32
    return %c0_i32, %c0_i32_0 : i32, i32
  }
  func.func @transform_3(%arg0: i32) -> (i32, i32) {
    %c0_i32 = arith.constant 0 : i32
    %c0_i32_0 = arith.constant 0 : i32
    %c0_i32_1 = arith.constant 0 : i32
    return %c0_i32, %c0_i32_0 : i32, i32
  }
  func.func @transform_4(%arg0: i32) -> (i32, i32) {
    %c0_i32 = arith.constant 0 : i32
    %c0_i32_0 = arith.constant 0 : i32
    %c0_i32_1 = arith.constant 0 : i32
    return %c0_i32, %c0_i32_0 : i32, i32
  }
  func.func @transform_5(%arg0: i32) -> (i32, i32) {
    %c0_i32 = arith.constant 0 : i32
    %c0_i32_0 = arith.constant 0 : i32
    return %arg0, %c0_i32 : i32, i32
  }
}

</mosaic_0001>

<bundles_post_ra>
// kernel: toy_fc_forward_prepared.1
= control target key start
LH: loop header
LB: loop body
LE: loop exit
PB: predicated region body
PF: predicated region fallthrough
CT: control target
= control target key end

     0   :  { %10 = vsyncpa [#allocation3], 0  ;;  %s1329_s18 = smov [#allocation2]   ;;  %s1445_s0 = inlined_call_operand.vmem [shape: f32[8,784], index: 0, kind: input, shape index: {}]   ;;  %s1446_s1 = inlined_call_operand.hbm [shape: bf16[784,256], index: 1, kind: input, shape index: {}]   ;;  %s1447_s2 = inlined_call_operand.vmem [shape: f32[1,256], index: 2, kind: input, shape index: {}]   ;;  %s1448_s3 = inlined_call_operand.vmem [shape: bf16[256,128], index: 3, kind: input, shape index: {}]   ;;  %s1449_s4 = inlined_call_operand.vmem [shape: f32[1,128], index: 4, kind: input, shape index: {}]   ;;  %s1450_s5 = inlined_call_operand.vmem [shape: f32[8,128], index: 5, kind: output, shape index: {}]  }
   0x1   :  { %s18_s19 = sshll.u32 %s1329_s18, 4  ;;  %s19_s19 = int_to_ptr.vmem [resolvable:$true] %s18_s19 }
   0x2   :  { %s1315_s20 = scalar_lea.vmem %s19_s19, 12544  ;;  %p1320_p1 = scmp.lt.s32.totalorder %s19_s19, %s19_s19 }
   0x3   :  { %p1316_p0 = scmp.ne.s32.totalorder %s19_s19, %s1315_s20  ;;  %p1321_p2 = scmp.lt.s32.totalorder %s1315_s20, %s1315_s20 }
   0x5   :  { %p1322_p3 = por %p1321_p2, %p1320_p1 }
   0x7   :  { %p1323_p4 = pnand %p1322_p3, %p1316_p0 }
   0x9   :  { %1326 = shalt.err (!%p1323_p4)
}
   0xa   :  { %s1330_s21 = smov 128   ;;  %s1331_s22 = smov 8  }
   0xb   :  { %24 = dma.hbm_to_vmem [thread:$0]  %s1446_s1, 12544, %s19_s19, [#allocation3], %s1330_s21, %s1330_s21, %s1331_s22  }
   0xc   :  { %1327 = dma.done.wait [#allocation3], 12544  }
   0xd   :  { %1328 = vsyncadd [#allocation3], 4294954752  ;;  %v1144_v0 = vld [vmem:[#allocation2 + $0x74] ss:$8 sps:$4 sm:$0xff]   ;;  %v1146_v1 = vld [vmem:[#allocation2 + $0x70] ss:$8 sps:$4 sm:$0xff]  }
   0xe   :  { %653 = vmatprep.subr.bf16.mxu0 %v1144_v0  ;;  %v1147_v2 = vld [vmem:[#allocation2 + $0x174] ss:$8 sps:$4 sm:$0xff]   ;;  %v1149_v3 = vld [vmem:[#allocation2 + $0x170] ss:$8 sps:$4 sm:$0xff]   ;;  %v1150_v4 = vld [vmem:[#allocation2 + $0x64] ss:$8 sps:$4 sm:$0xff]  }
   0xf   :  { %654 = vmatpush1.bf16.msra.mxu0 %v1146_v1  ;;  %v1152_v5 = vld [vmem:[#allocation2 + $0x60] ss:$8 sps:$4 sm:$0xff]   ;;  %694 = vmatprep.subr.bf16.mxu1 %v1147_v2  ;;  %v1153_v6 = vld [vmem:[#allocation2 + $0x164] ss:$8 sps:$4 sm:$0xff]   ;;  %v1156_v8 = vld [vmem:[#allocation2 + $0x54] ss:$8 sps:$4 sm:$0xff]  }
  0x10   :  { %695 = vmatpush1.bf16.msra.mxu1 %v1149_v3  ;;  %655 = vmatprep.subr.bf16.mxu0 %v1150_v4  ;;  %v1155_v7 = vld [vmem:[#allocation2 + $0x160] ss:$8 sps:$4 sm:$0xff]   ;;  %v1158_v9 = vld [vmem:[#allocation2 + $0x50] ss:$8 sps:$4 sm:$0xff]   ;;  %v1159_v10 = vld [vmem:[#allocation2 + $0x154] ss:$8 sps:$4 sm:$0xff]  }
  0x11   :  { %696 = vmatprep.subr.bf16.mxu1 %v1153_v6  ;;  %v1162_v11 = vld [vmem:[#allocation2 + $0x44] ss:$8 sps:$4 sm:$0xff]   ;;  %v1161_v12 = vld [vmem:[#allocation2 + $0x150] ss:$8 sps:$4 sm:$0xff]   ;;  %v1164_v14 = vld [vmem:[#allocation2 + $0x40] ss:$8 sps:$4 sm:$0xff]  }
  0x12   :  { %v1165_v13 = vld [vmem:[#allocation2 + $0x144] ss:$8 sps:$4 sm:$0xff]   ;;  %v1168_v15 = vld [vmem:[#allocation2 + $0x34] ss:$8 sps:$4 sm:$0xff]   ;;  %v1167_v16 = vld [vmem:[#allocation2 + $0x140] ss:$8 sps:$4 sm:$0xff]  }
  0x13   :  { %656 = vmatpush1.bf16.msra.mxu0 %v1152_v5  ;;  %v1171_v17 = vld [vmem:[#allocation2 + $0x134] ss:$8 sps:$4 sm:$0xff]   ;;  %v1170_v18 = vld [vmem:[#allocation2 + $0x30] ss:$8 sps:$4 sm:$0xff]   ;;  %v1174_v19 = vld [vmem:[#allocation2 + $0x24] ss:$8 sps:$4 sm:$0xff]  }
  0x14   :  { %657 = vmatprep.subr.bf16.mxu0 %v1156_v8  ;;  %697 = vmatpush1.bf16.msra.mxu1 %v1155_v7  ;;  %v1173_v20 = vld [vmem:[#allocation2 + $0x130] ss:$8 sps:$4 sm:$0xff]   ;;  %v1177_v21 = vld [vmem:[#allocation2 + $0x124] ss:$8 sps:$4 sm:$0xff]   ;;  %v1176_v22 = vld [vmem:[#allocation2 + $0x20] ss:$8 sps:$4 sm:$0xff]  }
  0x15   :  { %698 = vmatprep.subr.bf16.mxu1 %v1159_v10  ;;  %v1180_v23 = vld [vmem:[#allocation2 + $0x14] ss:$8 sps:$4 sm:$0xff]   ;;  %v1179_v24 = vld [vmem:[#allocation2 + $0x120] ss:$8 sps:$4 sm:$0xff]   ;;  %v1182_v26 = vld [vmem:[#allocation2 + $0x10] ss:$8 sps:$4 sm:$0xff]  }
  0x16   :  { %v1183_v25 = vld [vmem:[#allocation2 + $0x114] ss:$8 sps:$4 sm:$0xff]   ;;  %v1186_v27 = vld [vmem:[#allocation2 + $0x4] ss:$8 sps:$4 sm:$0xff]   ;;  %v1185_v28 = vld [vmem:[#allocation2 + $0x110] ss:$8 sps:$4 sm:$0xff]  }
  0x17   :  { %658 = vmatpush1.bf16.msra.mxu0 %v1158_v9  ;;  %v1189_v29 = vld [vmem:[#allocation2 + $0x104] ss:$8 sps:$4 sm:$0xff]   ;;  %v1188_v30 = vld [vmem:[#allocation2] ss:$8 sps:$4 sm:$0xff]   ;;  %v1192_v31 = vld [vmem:[#allocation2 + $0xf4] ss:$8 sps:$4 sm:$0xff]  }
  0x18   :  { %659 = vmatprep.subr.bf16.mxu0 %v1162_v11  ;;  %699 = vmatpush1.bf16.msra.mxu1 %v1161_v12  ;;  %v1191_v32 = vld [vmem:[#allocation2 + $0x100] ss:$8 sps:$4 sm:$0xff]   ;;  %v1195_v33 = vld [vmem:[#allocation2 + $0x1f4] ss:$8 sps:$4 sm:$0xff]   ;;  %v1194_v34 = vld [vmem:[#allocation2 + $0xf0] ss:$8 sps:$4 sm:$0xff]  }
  0x19   :  { %700 = vmatprep.subr.bf16.mxu1 %v1165_v13  ;;  %v1198_v35 = vld [vmem:[#allocation2 + $0xe4] ss:$8 sps:$4 sm:$0xff]   ;;  %v1197_v36 = vld [vmem:[#allocation2 + $0x1f0] ss:$8 sps:$4 sm:$0xff]   ;;  %v1200_v38 = vld [vmem:[#allocation2 + $0xe0] ss:$8 sps:$4 sm:$0xff]  }
  0x1a   :  { %v1201_v37 = vld [vmem:[#allocation2 + $0x1e4] ss:$8 sps:$4 sm:$0xff]   ;;  %v1204_v39 = vld [vmem:[#allocation2 + $0xd4] ss:$8 sps:$4 sm:$0xff]   ;;  %v1203_v40 = vld [vmem:[#allocation2 + $0x1e0] ss:$8 sps:$4 sm:$0xff]  }
  0x1b   :  { %660 = vmatpush1.bf16.msra.mxu0 %v1164_v14  ;;  %v1207_v41 = vld [vmem:[#allocation2 + $0x1d4] ss:$8 sps:$4 sm:$0xff]   ;;  %v1206_v42 = vld [vmem:[#allocation2 + $0xd0] ss:$8 sps:$4 sm:$0xff]   ;;  %v1210_v43 = vld [vmem:[#allocation2 + $0xc4] ss:$8 sps:$4 sm:$0xff]  }
  0x1c   :  { %661 = vmatprep.subr.bf16.mxu0 %v1168_v15  ;;  %701 = vmatpush1.bf16.msra.mxu1 %v1167_v16  ;;  %v1209_v44 = vld [vmem:[#allocation2 + $0x1d0] ss:$8 sps:$4 sm:$0xff]   ;;  %v1213_v45 = vld [vmem:[#allocation2 + $0x1c4] ss:$8 sps:$4 sm:$0xff]   ;;  %v1212_v47 = vld [vmem:[#allocation2 + $0xc0] ss:$8 sps:$4 sm:$0xff]  }
  0x1d   :  { %702 = vmatprep.subr.bf16.mxu1 %v1171_v17  ;;  %v36_v46 = vld [vmem:[%s1445_s0 + $0x8] sm:$0xff]  ;;  %v1216_v49 = vld [vmem:[#allocation2 + $0xb4] ss:$8 sps:$4 sm:$0xff]   ;;  %v1218_v54 = vld [vmem:[#allocation2 + $0xb0] ss:$8 sps:$4 sm:$0xff]   ;;  %vm649_vm0 = vcmask 130048  }
  0x1e   :  { %v43_v48 = vpack.c.bf16 %v36_v46, %v36_v46  ;;  %v38_v50 = vld [vmem:[%s1445_s0 + $0x18] sm:$0xff]  ;;  %v1215_v51 = vld [vmem:[#allocation2 + $0x1c0] ss:$8 sps:$4 sm:$0xff]   ;;  %v1222_v55 = vld [vmem:[#allocation2 + $0xa4] ss:$8 sps:$4 sm:$0xff]  }
  0x1f   :  { %662 = vmatpush1.bf16.msra.mxu0 %v1170_v18  ;;  %v45_v52 = vpack.c.bf16 %v38_v50, %v38_v50  ;;  %v1219_v53 = vld [vmem:[#allocation2 + $0x1b4] ss:$8 sps:$4 sm:$0xff]   ;;  %v1221_v56 = vld [vmem:[#allocation2 + $0x1b0] ss:$8 sps:$4 sm:$0xff]   ;;  %v1225_v57 = vld [vmem:[#allocation2 + $0x1a4] ss:$8 sps:$4 sm:$0xff]  }
  0x20   :  { %663 = vmatprep.subr.bf16.mxu0 %v1174_v19  ;;  %703 = vmatpush1.bf16.msra.mxu1 %v1173_v20  ;;  %v1224_v58 = vld [vmem:[#allocation2 + $0xa0] ss:$8 sps:$4 sm:$0xff]   ;;  %v1228_v59 = vld [vmem:[#allocation2 + $0x94] ss:$8 sps:$4 sm:$0xff]   ;;  %v1230_v62 = vld [vmem:[#allocation2 + $0x90] ss:$8 sps:$4 sm:$0xff]  }
  0x21   :  { %704 = vmatprep.subr.bf16.mxu1 %v1177_v21  ;;  %685 = vmatprep.mubr.bf16.mxu0 %v43_v48  ;;  %v1227_v60 = vld [vmem:[#allocation2 + $0x1a0] ss:$8 sps:$4 sm:$0xff]   ;;  %v1231_v61 = vld [vmem:[#allocation2 + $0x194] ss:$8 sps:$4 sm:$0xff]   ;;  %v1234_v63 = vld [vmem:[#allocation2 + $0x84] ss:$8 sps:$4 sm:$0xff]  }
  0x22   :  { %726 = vmatprep.mubr.bf16.mxu1 %v45_v52  ;;  %v1233_v0 = vld [vmem:[#allocation2 + $0x190] ss:$8 sps:$4 sm:$0xff]   ;;  %v1236_v1 = vld [vmem:[#allocation2 + $0x80] ss:$8 sps:$4 sm:$0xff]   ;;  %v1237_v2 = vld [vmem:[#allocation2 + $0x184] ss:$8 sps:$4 sm:$0xff]  }
  0x23   :  { %664 = vmatpush1.bf16.msra.mxu0 %v1176_v22  ;;  %v1239_v3 = vld [vmem:[#allocation2 + $0x180] ss:$8 sps:$4 sm:$0xff]   ;;  %v1242_v5 = vld [vmem:[#allocation2 + $0x274] ss:$8 sps:$4 sm:$0xff]   ;;  %v1240_v8 = vld [vmem:[#allocation2 + $0x270] ss:$8 sps:$4 sm:$0xff]  }
  0x24   :  { %665 = vmatprep.subr.bf16.mxu0 %v1180_v23  ;;  %705 = vmatpush1.bf16.msra.mxu1 %v1179_v24  ;;  %v35_v4 = vld [vmem:[%s1445_s0] sm:$0xff]  ;;  %v37_v6 = vld [vmem:[%s1445_s0 + $0x10] sm:$0xff]  ;;  %v40_v16 = vld [vmem:[%s1445_s0 + $0x28] sm:$0xff]  ;;  %v1332_v19 = vmov 0  }
  0x25   :  { %706 = vmatprep.subr.bf16.mxu1 %v1183_v25  ;;  %v42_v7 = vpack.c.bf16 %v35_v4, %v35_v4  ;;  %v1245_v9 = vld [vmem:[#allocation2 + $0x264] ss:$8 sps:$4 sm:$0xff]   ;;  %v44_v10 = vpack.c.bf16 %v37_v6, %v37_v6  ;;  %v1285_v11 = vld [vmem:[#allocation2 + $0x300] ss:$8 sps:$4 sm:$0xff]   ;;  %v1248_v14 = vld [vmem:[#allocation2 + $0x254] ss:$8 sps:$4 sm:$0xff]   ;;  %v47_v17 = vpack.c.bf16 %v40_v16, %v40_v16 }
  0x26   :  { %v1287_v12 = vld [vmem:[#allocation2 + $0x304] ss:$8 sps:$4 sm:$0xff]   ;;  %v1243_v13 = vld [vmem:[#allocation2 + $0x260] ss:$8 sps:$4 sm:$0xff]   ;;  %v41_v15 = vld [vmem:[%s1445_s0 + $0x30] sm:$0xff] }
  0x27   :  { %666 = vmatpush1.bf16.msra.mxu0 %v1182_v26  ;;  %v1246_v18 = vld [vmem:[#allocation2 + $0x250] ss:$8 sps:$4 sm:$0xff]   ;;  %v1251_v20 = vld [vmem:[#allocation2 + $0x244] ss:$8 sps:$4 sm:$0xff]   ;;  %v48_v21 = vpack.c.bf16 %v41_v15, %v41_v15  ;;  %v1249_v22 = vld [vmem:[#allocation2 + $0x240] ss:$8 sps:$4 sm:$0xff]  }
  0x28   :  { %667 = vmatprep.subr.bf16.mxu0 %v1186_v27  ;;  %707 = vmatpush1.bf16.msra.mxu1 %v1185_v28  ;;  %v1254_v23 = vld [vmem:[#allocation2 + $0x234] ss:$8 sps:$4 sm:$0xff]   ;;  %v1252_v24 = vld [vmem:[#allocation2 + $0x230] ss:$8 sps:$4 sm:$0xff]   ;;  %v1257_v25 = vld [vmem:[#allocation2 + $0x224] ss:$8 sps:$4 sm:$0xff]  }
  0x29   :  { %708 = vmatprep.subr.bf16.mxu1 %v1189_v29  ;;  %v1255_v26 = vld [vmem:[#allocation2 + $0x220] ss:$8 sps:$4 sm:$0xff]   ;;  %v1260_v27 = vld [vmem:[#allocation2 + $0x214] ss:$8 sps:$4 sm:$0xff]   ;;  %v1258_v28 = vld [vmem:[#allocation2 + $0x210] ss:$8 sps:$4 sm:$0xff]  }
  0x2a   :  { %v1263_v29 = vld [vmem:[#allocation2 + $0x204] ss:$8 sps:$4 sm:$0xff]   ;;  %v1288_v46 = vld [vmem:[#allocation2 + $0x280] ss:$8 sps:$4 sm:$0xff]   ;;  %v1292_v50 = vld [vmem:[%s1448_s3 + $0x38] sm:$0xff]  }
  0x2b   :  { %668 = vmatpush1.bf16.msra.mxu0 %v1188_v30  ;;  %v1261_v30 = vld [vmem:[#allocation2 + $0x200] ss:$8 sps:$4 sm:$0xff]   ;;  %v1294_v52 = vld [vmem:[%s1448_s3 + $0x30] sm:$0xff]  }
  0x2c   :  { %669 = vmatprep.subr.bf16.mxu0 %v1192_v31  ;;  %709 = vmatpush1.bf16.msra.mxu1 %v1191_v32  ;;  %v1266_v31 = vld [vmem:[#allocation2 + $0x2f4] ss:$8 sps:$4 sm:$0xff]   ;;  %v1264_v32 = vld [vmem:[#allocation2 + $0x2f0] ss:$8 sps:$4 sm:$0xff]   ;;  %v147_v16 = vld [vmem:[%s1447_s2] sm:$0x3] }
  0x2d   :  { %710 = vmatprep.subr.bf16.mxu1 %v1195_v33  ;;  %v1269_v33 = vld [vmem:[#allocation2 + $0x2e4] ss:$8 sps:$4 sm:$0xff]  }
  0x2f   :  { %670 = vmatpush2.bf16.msra.mxu0 %v1194_v34  ;;  %v1267_v34 = vld [vmem:[#allocation2 + $0x2e0] ss:$8 sps:$4 sm:$0xff]  }
  0x30   :  { %671 = vmatprep.subr.bf16.mxu0 %v1198_v35  ;;  %711 = vmatpush2.bf16.msra.mxu1 %v1197_v36  ;;  %v1272_v35 = vld [vmem:[#allocation2 + $0x2d4] ss:$8 sps:$4 sm:$0xff]   ;;  %v1270_v36 = vld [vmem:[#allocation2 + $0x2d0] ss:$8 sps:$4 sm:$0xff]  }
  0x31   :  { %712 = vmatprep.subr.bf16.mxu1 %v1201_v37  ;;  %v1275_v37 = vld [vmem:[#allocation2 + $0x2c4] ss:$8 sps:$4 sm:$0xff]  }
  0x33   :  { %672 = vmatpush2.bf16.msra.mxu0 %v1200_v38  ;;  %v1273_v38 = vld [vmem:[#allocation2 + $0x2c0] ss:$8 sps:$4 sm:$0xff]  }
  0x34   :  { %673 = vmatprep.subr.bf16.mxu0 %v1204_v39  ;;  %713 = vmatpush2.bf16.msra.mxu1 %v1203_v40  ;;  %v1278_v39 = vld [vmem:[#allocation2 + $0x2b4] ss:$8 sps:$4 sm:$0xff]   ;;  %v1276_v40 = vld [vmem:[#allocation2 + $0x2b0] ss:$8 sps:$4 sm:$0xff]  }
  0x35   :  { %714 = vmatprep.subr.bf16.mxu1 %v1207_v41  ;;  %v1281_v41 = vld [vmem:[#allocation2 + $0x2a4] ss:$8 sps:$4 sm:$0xff]  }
  0x37   :  { %674 = vmatpush2.bf16.msra.mxu0 %v1206_v42  ;;  %v1279_v42 = vld [vmem:[#allocation2 + $0x2a0] ss:$8 sps:$4 sm:$0xff]  }
  0x38   :  { %675 = vmatprep.subr.bf16.mxu0 %v1210_v43  ;;  %715 = vmatpush2.bf16.msra.mxu1 %v1209_v44  ;;  %v1284_v43 = vld [vmem:[#allocation2 + $0x294] ss:$8 sps:$4 sm:$0xff]   ;;  %v1282_v44 = vld [vmem:[#allocation2 + $0x290] ss:$8 sps:$4 sm:$0xff]  }
  0x39   :  { %716 = vmatprep.subr.bf16.mxu1 %v1213_v45  ;;  %v1290_v45 = vld [vmem:[#allocation2 + $0x284] ss:$8 sps:$4 sm:$0xff]  }
  0x3b   :  { %676 = vmatpush2.bf16.msra.mxu0 %v1212_v47  ;;  %v39_v47 = vld [vmem:[%s1445_s0 + $0x20] sm:$0xff] }
  0x3c   :  { %677 = vmatprep.subr.bf16.mxu0 %v1216_v49  ;;  %717 = vmatpush2.bf16.msra.mxu1 %v1215_v51  ;;  %v46_v48 = vpack.c.bf16 %v39_v47, %v39_v47  ;;  %v1291_v49 = vld [vmem:[%s1448_s3 + $0x78] sm:$0xff]   ;;  %v1293_v51 = vld [vmem:[%s1448_s3 + $0x70] sm:$0xff]  }
  0x3d   :  { %718 = vmatprep.subr.bf16.mxu1 %v1219_v53  ;;  %v1295_v53 = vld [vmem:[%s1448_s3 + $0x68] sm:$0xff]  }
  0x3f   :  { %678 = vmatpush2.bf16.msra.mxu0 %v1218_v54  ;;  %v1296_v54 = vld [vmem:[%s1448_s3 + $0x28] sm:$0xff]  }
  0x40   :  { %679 = vmatprep.subr.bf16.mxu0 %v1222_v55  ;;  %719 = vmatpush2.bf16.msra.mxu1 %v1221_v56  ;;  %v1297_v55 = vld [vmem:[%s1448_s3 + $0x60] sm:$0xff]  }
  0x41   :  { %720 = vmatprep.subr.bf16.mxu1 %v1225_v57  ;;  %v1298_v56 = vld [vmem:[%s1448_s3 + $0x20] sm:$0xff]   ;;  %v1299_v57 = vld [vmem:[%s1448_s3 + $0x58] sm:$0xff]  }
  0x43   :  { %680 = vmatpush2.bf16.msra.mxu0 %v1224_v58  ;;  %v1300_v58 = vld [vmem:[%s1448_s3 + $0x18] sm:$0xff]  }
  0x44   :  { %681 = vmatprep.subr.bf16.mxu0 %v1228_v59  ;;  %721 = vmatpush2.bf16.msra.mxu1 %v1227_v60  ;;  %v1301_v59 = vld [vmem:[%s1448_s3 + $0x50] sm:$0xff]  }
  0x45   :  { %722 = vmatprep.subr.bf16.mxu1 %v1231_v61  ;;  %v1302_v60 = vld [vmem:[%s1448_s3 + $0x10] sm:$0xff]   ;;  %v1303_v61 = vld [vmem:[%s1448_s3 + $0x48] sm:$0xff]  }
  0x47   :  { %682 = vmatpush2.bf16.msra.mxu0 %v1230_v62  ;;  %v1304_v62 = vld [vmem:[%s1448_s3 + $0x8] sm:$0xff]  }
  0x48   :  { %683 = vmatprep.subr.bf16.mxu0 %v1234_v63  ;;  %723 = vmatpush2.bf16.msra.mxu1 %v1233_v0  ;;  %v1305_v63 = vld [vmem:[%s1448_s3 + $0x40] sm:$0xff]  }
  0x49   :  { %724 = vmatprep.subr.bf16.mxu1 %v1237_v2  ;;  %v1306_v0 = vld [vmem:[%s1448_s3] sm:$0xff]  }
  0x4b   :  { %684 = vmatpush2.bf16.msra.mxu0 %v1236_v1 }
  0x4c   :  { %735 = vmatprep.subr.bf16.mxu0 %v1242_v5  ;;  %725 = vmatpush2.bf16.msra.mxu1 %v1239_v3 }
  0x4d   :  { %790 = vmatprep.subr.bf16.mxu1 %v1287_v12 }
  0x4e   :  { %686 = vmatmul.mubr.bf16.vlgmr.msra.gmra.mxu0 %v42_v7 }
  0x4f   :  { %736 = vmatpush1.bf16.msra.mxu0 %v1240_v8  ;;  %727 = vmatmul.mubr.bf16.vlgmr.msra.gmra.mxu1 %v44_v10 }
  0x50   :  { %737 = vmatprep.subr.bf16.mxu0 %v1245_v9  ;;  %791 = vmatpush1.bf16.msra.mxu1 %v1285_v11 }
  0x51   :  { %808 = vmatprep.mubr.bf16.mxu1 %v1332_v19  ;;  %767 = vmatprep.mubr.bf16.mxu0 %v47_v17 }
  0x52   :  { %1118 = vmatprep.subr.bf16.mxu1 %v1291_v49 }
  0x53   :  { %738 = vmatpush1.bf16.msra.mxu0 %v1243_v13  ;;  %v149_v13 = vlaneseq }
  0x54   :  { %739 = vmatprep.subr.bf16.mxu0 %v1248_v14 }
  0x55   :  { %v150_v14 = vshrl.u32 %v149_v13, 7 }
  0x57   :  { %740 = vmatpush1.bf16.msra.mxu0 %v1246_v18  ;;  %1100 = vmatmul.mubr.msk.bf16.vlgmr.msra.gmra.mxu1 %vm649_vm0, %v48_v21  ;;  %v151_v15 = vsub.s32 0, %v150_v14  ;;  %v155_v17 = vsub.s32 1, %v150_v14 }
  0x58   :  { %741 = vmatprep.subr.bf16.mxu0 %v1251_v20  ;;  %1119 = vmatpush3.bf16.msra.mxu1 %v1292_v50 }
  0x59   :  { %1120 = vmatprep.subr.bf16.mxu1 %v1293_v51  ;;  %v152_v18 = vrot.slane %v147_v16, %v151_v15  ;;  %v156_v19 = vrot.slane %v147_v16, %v155_v17 }
  0x5b   :  { %742 = vmatpush1.bf16.msra.mxu0 %v1249_v22 }
  0x5c   :  { %743 = vmatprep.subr.bf16.mxu0 %v1254_v23  ;;  %1121 = vmatpush3.bf16.msra.mxu1 %v1294_v52 }
  0x5d   :  { %1122 = vmatprep.subr.bf16.mxu1 %v1295_v53 }
  0x5f   :  { %744 = vmatpush1.bf16.msra.mxu0 %v1252_v24 }
  0x60   :  { %745 = vmatprep.subr.bf16.mxu0 %v1257_v25  ;;  %1123 = vmatpush3.bf16.msra.mxu1 %v1296_v54 }
  0x61   :  { %1124 = vmatprep.subr.bf16.mxu1 %v1297_v55 }
  0x63   :  { %746 = vmatpush1.bf16.msra.mxu0 %v1255_v26 }
  0x64   :  { %747 = vmatprep.subr.bf16.mxu0 %v1260_v27  ;;  %1125 = vmatpush3.bf16.msra.mxu1 %v1298_v56 }
  0x65   :  { %1126 = vmatprep.subr.bf16.mxu1 %v1299_v57 }
  0x67   :  { %748 = vmatpush1.bf16.msra.mxu0 %v1258_v28 }
  0x68   :  { %749 = vmatprep.subr.bf16.mxu0 %v1263_v29  ;;  %1127 = vmatpush3.bf16.msra.mxu1 %v1300_v58 }
  0x69   :  { %1128 = vmatprep.subr.bf16.mxu1 %v1301_v59 }
  0x6b   :  { %750 = vmatpush1.bf16.msra.mxu0 %v1261_v30 }
  0x6c   :  { %751 = vmatprep.subr.bf16.mxu0 %v1266_v31  ;;  %1129 = vmatpush3.bf16.msra.mxu1 %v1302_v60 }
  0x6d   :  { %1130 = vmatprep.subr.bf16.mxu1 %v1303_v61 }
  0x6f   :  { %752 = vmatpush2.bf16.msra.mxu0 %v1264_v32 }
  0x70   :  { %753 = vmatprep.subr.bf16.mxu0 %v1269_v33  ;;  %1131 = vmatpush3.bf16.msra.mxu1 %v1304_v62 }
  0x71   :  { %1132 = vmatprep.subr.bf16.mxu1 %v1305_v63 }
  0x73   :  { %754 = vmatpush2.bf16.msra.mxu0 %v1267_v34 }
  0x74   :  { %755 = vmatprep.subr.bf16.mxu0 %v1272_v35  ;;  %1133 = vmatpush3.bf16.msra.mxu1 %v1306_v0 }
  0x77   :  { %756 = vmatpush2.bf16.msra.mxu0 %v1270_v36 }
  0x78   :  { %757 = vmatprep.subr.bf16.mxu0 %v1275_v37  ;;  %v1101_v37 = vld [vmem:[%s1449_s4] ss:$0 sm:$0xff] }
  0x7b   :  { %758 = vmatpush2.bf16.msra.mxu0 %v1273_v38 }
  0x7c   :  { %759 = vmatprep.subr.bf16.mxu0 %v1278_v39 }
  0x7f   :  { %760 = vmatpush2.bf16.msra.mxu0 %v1276_v40 }
  0x80   :  { %761 = vmatprep.subr.bf16.mxu0 %v1281_v41 }
  0x83   :  { %762 = vmatpush2.bf16.msra.mxu0 %v1279_v42 }
  0x84   :  { %763 = vmatprep.subr.bf16.mxu0 %v1284_v43 }
  0x87   :  { %764 = vmatpush2.bf16.msra.mxu0 %v1282_v44 }
  0x88   :  { %765 = vmatprep.subr.bf16.mxu0 %v1290_v45 }
  0x8b   :  { %766 = vmatpush2.bf16.msra.mxu0 %v1288_v46 }
  0x8e   :  { %768 = vmatmul.mubr.bf16.vlgmr.msra.gmra.mxu0 %v46_v48 }
 0x10e   :  { %v687_v1 = vpop.f32.mrf.mxu0 }
 0x10f   :  { %v728_v3 = vpop.f32.mrf.mxu1  ;;  %v688_v20 = vadd.f32 %v687_v1, %v152_v18 }
 0x110   :  { %v689_v2 = vpop.f32.mrf.mxu0 }
 0x111   :  { %v730_v5 = vpop.f32.mrf.mxu1  ;;  %v690_v21 = vadd.f32 %v689_v2, %v156_v19  ;;  %v729_v22 = vadd.f32 %v728_v3, %v688_v20 }
 0x112   :  { %v691_v4 = vpop.f32.mrf.mxu0 }
 0x113   :  { %v732_v7 = vpop.f32.mrf.mxu1  ;;  %v731_v24 = vadd.f32 %v730_v5, %v690_v21 }
 0x114   :  { %v692_v6 = vpop.f32.mrf.mxu0 }
 0x115   :  { %v733_v8 = vpop.f32.mrf.mxu1 }
 0x117   :  { %v810_v9 = vpop.f32.mrf.mxu1 }
 0x119   :  { %v812_v10 = vpop.f32.mrf.mxu1 }
 0x11b   :  { %v814_v11 = vpop.f32.mrf.mxu1 }
 0x11d   :  { %v815_v12 = vpop.f32.mrf.mxu1 }
 0x14e   :  { %v769_v23 = vpop.f32.mrf.mxu0 }
 0x14f   :  { %v770_v25 = vadd.f32 %v769_v23, %v729_v22 }
 0x150   :  { %v771_v26 = vpop.f32.mrf.mxu0 }
 0x151   :  { %v811_v27 = vadd.f32 %v810_v9, %v770_v25  ;;  %v772_v28 = vadd.f32 %v771_v26, %v731_v24 }
 0x152   :  { %v773_v29 = vpop.f32.mrf.mxu0 }
 0x153   :  { %v813_v30 = vadd.f32 %v812_v10, %v772_v28  ;;  %v817_v31 = vmax.f32 %v811_v27, 0.0 }
 0x154   :  { %v774_v32 = vpop.f32.mrf.mxu0 }
 0x155   :  { %v818_v33 = vmax.f32 %v813_v30, 0.0  ;;  %v819_v35 = vpack.c.bf16 %v817_v31, %v817_v31 }
 0x157   :  { %v820_v34 = vpack.c.bf16 %v818_v33, %v818_v33 }
 0x159   :  { %988 = vmatprep.mubr.bf16.mxu1 %v820_v34 }
 0x15a   :  { %989 = vmatmul.mubr.bf16.vlgmr.msra.gmra.mxu1 %v819_v35 }
 0x21a   :  { %v1134_v36 = vpop.f32.mrf.mxu1 }
 0x21c   :  { %v1135_v38 = vpop.f32.mrf.mxu1 }
 0x21d   :  { %v1136_v39 = vadd.f32 %v1135_v38, %v1134_v36 }
 0x21e   :  { %v1137_v40 = vpop.f32.mrf.mxu1 }
 0x21f   :  { %v991_v41 = vadd.f32 %v1136_v39, %v1101_v37 }
 0x220   :  { %v1138_v42 = vpop.f32.mrf.mxu1 }
 0x221   :  { %996 = vst [vmem:[%s1450_s5] sm:$0xff] %v991_v41 }
 0x222   :  { %1001 = vsyncpa [#allocation3], 1 }

</bundles_post_ra>
